<compile_context>
chip_gen: v6e
topology: v6e:2x2x1
jax: 0.10.0
libtpu: 0.0.40
codegen_flags: <defaults>
</compile_context>

<pallas_src>
import functools

import jax
import jax.numpy as jnp
from jax.experimental import pallas as pl
from jax.experimental.pallas import tpu as pltpu

_SELU_ALPHA = 1.6732632423543772
_SELU_SCALE = 1.0507009873554805

_MAX_PRELU_TILE_C = 2048   # lanes per PReLU block (multiple of 128)


def _round_up(v, m):
    return ((v + m - 1) // m) * m


def _sublane_multiple(dtype):
    # f32 -> 8, bf16 -> 16, int8/fp8 -> 32 (packed sublanes).
    itemsize = jnp.dtype(dtype).itemsize
    return 8 * max(1, 4 // itemsize)


@functools.lru_cache(maxsize=1)
def _vmem_capacity_bytes():
    try:
        return int(pltpu.get_tpu_info().vmem_capacity_bytes)
    except Exception:
        return 128 << 20   # conservative default (v5e/v6e)


def _target_block_bytes():
    # ~8 MiB blocks on 128-MiB-VMEM chips (v5e/v6e), ~4 MiB on v7x (64 MiB VMEM):
    # amortizes the ~0.35us/grid-step overhead while staying far from VMEM limits.
    return (8 << 20) if _vmem_capacity_bytes() >= (96 << 20) else (4 << 20)


def _vmem_limit(per_step_bytes):
    """Scoped VMEM request: double-buffered blocks + headroom, capped to the chip."""
    cap = min(_vmem_capacity_bytes() - (8 << 20), 100 << 20)
    need = 2 * per_step_bytes + (4 << 20)
    return int(min(cap, max(32 << 20, need)))


def _pick_tile_r(rows, bytes_per_row, dtype):
    """Row-tile: ~target-block-bytes worth of rows, sublane-aligned, and split so
    the grid has >= 2 steps (both v7x TensorCores get work) whenever rows allow."""
    sub = _sublane_multiple(dtype)
    if rows <= sub:
        return rows                       # single ragged block; full-dim extent is legal
    target_rows = max(sub, (_target_block_bytes() // max(bytes_per_row, 1)) // sub * sub)
    half_rows = _round_up(-(-rows // 2), sub)
    return max(sub, min(target_rows, half_rows))


# ---------------------------------------------------------------------------
# Kernel bodies
# ---------------------------------------------------------------------------
def _elementwise_kernel(relu_type, x_ref, o_ref):
    x = x_ref[...]
    if relu_type == "relu":
        o_ref[...] = jnp.maximum(x, jnp.zeros_like(x))
    elif relu_type == "leakyrelu":
        # GPEN's ReluLayer uses nn.LeakyReLU(0.2) (not PyTorch's 0.01 default).
        o_ref[...] = jnp.where(x >= 0, x, jnp.asarray(0.2, x.dtype) * x)
    elif relu_type == "selu":
        xf = x.astype(jnp.float32)
        neg = _SELU_ALPHA * (jnp.exp(jnp.minimum(xf, 0.0)) - 1.0)
        y = _SELU_SCALE * jnp.where(xf > 0, xf, neg)
        o_ref[...] = y.astype(x.dtype)
    else:
        raise ValueError(f"Relu type {relu_type} not support.")


def _prelu_kernel(x_ref, alpha_ref, o_ref):
    x = x_ref[...]
    a = alpha_ref[...]          # (tile_r, 1) per-row (= per-channel) slope, broadcasts
    o_ref[...] = jnp.where(x >= 0, x, a * x)


# ---------------------------------------------------------------------------
# Forward paths
# ---------------------------------------------------------------------------
def _pointwise_forward(x, relu_type):
    """relu / leakyrelu / selu: lane-dense 2-D view, no padding, 1 read + 1 write."""
    orig_shape = x.shape
    dtype = x.dtype
    itemsize = jnp.dtype(dtype).itemsize
    total = x.size

    cols = None
    for c in (512, 256, 128):
        if total % c == 0:
            cols = c
            break

    padded = False
    if cols is None:
        # total not a multiple of 128 (rare for conv feature maps): pad fallback.
        # TODO(synk): avoid the pad/slice copies for non-128-multiple element counts.
        cols = 512
        rows = -(-total // cols)
        x_flat = jnp.pad(x.reshape(-1), (0, rows * cols - total))
        padded = True
    else:
        rows = total // cols
        x_flat = x.reshape(-1)

    x2 = x_flat.reshape(rows, cols)
    tile_r = _pick_tile_r(rows, cols * itemsize, dtype)
    grid = (pl.cdiv(rows, tile_r),)
    block_bytes = tile_r * cols * itemsize   # one x block (out block is same size)

    out2 = pl.pallas_call(
        functools.partial(_elementwise_kernel, relu_type),
        out_shape=jax.ShapeDtypeStruct((rows, cols), dtype),
        grid=grid,
        in_specs=[pl.BlockSpec((tile_r, cols), lambda i: (i, 0))],
        out_specs=pl.BlockSpec((tile_r, cols), lambda i: (i, 0)),
        compiler_params=pltpu.CompilerParams(
            dimension_semantics=("parallel",),
            vmem_limit_bytes=_vmem_limit(2 * block_bytes)),
    )(x2)

    out_flat = out2.reshape(-1)
    if padded:
        out_flat = out_flat[:total]
    return out_flat.reshape(orig_shape)


def _prelu_forward(x, prelu_weight):
    """PReLU: (N*C, H*W) view tiled in 2-D; per-channel slope broadcast per row."""
    N, C, H, W = x.shape
    dtype = x.dtype
    itemsize = jnp.dtype(dtype).itemsize
    rows = N * C
    cols = H * W

    x2 = x.reshape(rows, cols)
    # Row n*C + c gets prelu_weight[c]; tiny (rows, 1) array, negligible traffic.
    alpha = jnp.tile(prelu_weight.astype(dtype), (N,)).reshape(rows, 1)

    # Column tile: full map when small, else a lane-dense 128-multiple
    # (ragged last column block is masked by Pallas).
    tile_c = cols if cols <= _MAX_PRELU_TILE_C else _MAX_PRELU_TILE_C
    tile_r = _pick_tile_r(rows, tile_c * itemsize, dtype)

    grid = (pl.cdiv(rows, tile_r), pl.cdiv(cols, tile_c))
    block_bytes = tile_r * tile_c * itemsize
    per_step = 2 * block_bytes + tile_r * itemsize   # x + out + alpha blocks

    out2 = pl.pallas_call(
        _prelu_kernel,
        out_shape=jax.ShapeDtypeStruct((rows, cols), dtype),
        grid=grid,
        in_specs=[
            pl.BlockSpec((tile_r, tile_c), lambda i, j: (i, j)),
            pl.BlockSpec((tile_r, 1), lambda i, j: (i, 0)),
        ],
        out_specs=pl.BlockSpec((tile_r, tile_c), lambda i, j: (i, j)),
        compiler_params=pltpu.CompilerParams(
            dimension_semantics=("parallel", "parallel"),
            vmem_limit_bytes=_vmem_limit(per_step)),
    )(x2, alpha)

    return out2.reshape(N, C, H, W)


@functools.partial(jax.jit, static_argnames=("relu_type",))
def relu_layer(x, prelu_weight, relu_type="relu"):
    """Pallas ReluLayer forward.

    x:            (N, C, H, W)  NCHW, matching the PyTorch module.
    prelu_weight: (C,) per-channel PReLU slope (only used for relu_type='prelu').
    """
    relu_type = relu_type.lower()
    if relu_type == "none":
        return x   # identity: skip the pointless HBM->VMEM->HBM copy entirely
    if relu_type == "prelu":
        return _prelu_forward(x, prelu_weight)
    if relu_type in ("relu", "leakyrelu", "selu"):
        return _pointwise_forward(x, relu_type)
    raise ValueError(f"Relu type {relu_type} not support.")


# ---------------------------------------------------------------------------
# Reference + test
# ---------------------------------------------------------------------------
def _reference(x, prelu_weight, relu_type):
    """Pure-JAX reference mirroring torch.nn semantics."""
    relu_type = relu_type.lower()
    if relu_type == "relu":
        return jnp.maximum(x, 0)
    if relu_type == "leakyrelu":
        return jnp.where(x >= 0, x, 0.2 * x)
    if relu_type == "prelu":
        a = prelu_weight.reshape(1, -1, 1, 1).astype(x.dtype)
        return jnp.where(x >= 0, x, a * x)
    if relu_type == "selu":
        return _SELU_SCALE * jnp.where(x > 0, x, _SELU_ALPHA * (jnp.exp(x) - 1.0))
    if relu_type == "none":
        return x
    raise ValueError(relu_type)


if __name__ == "__main__":
    key = jax.random.PRNGKey(0)
    N, C, H, W = 2, 4, 16, 16
    x = jax.random.normal(key, (N, C, H, W), dtype=jnp.float32)

    # Deterministic PReLU parameter init: nn.PReLU default is 0.25 per channel.
    prelu_weight = jnp.full((C,), 0.25, dtype=jnp.float32)

    ok = True
    for relu_type in ("relu", "leakyrelu", "prelu", "selu", "none"):
        y = relu_layer(x, prelu_weight, relu_type=relu_type)
        jax.block_until_ready(y)
        y_ref = _reference(x, prelu_weight, relu_type)
        if y.shape != x.shape or not jnp.allclose(y, y_ref, atol=1e-5, rtol=1e-5):
            ok = False
            print(f"MISMATCH for relu_type={relu_type}")

    if ok:
        print("KERNEL_OK")
</pallas_src>

<mosaic_0001>
module attributes {stable_mosaic.version = 11 : i64} {
  func.func @_elementwise_kernel(%arg0: i32, %arg1: memref<4x512xf32, #tpu.memory_space<vmem>>, %arg2: memref<4x512xf32, #tpu.memory_space<vmem>>) attributes {dimension_semantics = [#tpu.dimension_semantics<parallel>], iteration_bounds = array<i64: 1>, scalar_prefetch = 0 : i64, scratch_operands = 0 : i64, tpu.core_type = #tpu.core_type<tc>, window_params = [{transform_indices = @transform_0, window_bounds = array<i64: 4, 512>}, {transform_indices = @transform_1, window_bounds = array<i64: 4, 512>}]} {
    %c0 = arith.constant 0 : index
    %c0_0 = arith.constant 0 : index
    %0 = vector.load %arg1[%c0, %c0_0] : memref<4x512xf32, #tpu.memory_space<vmem>>, vector<4x512xf32>
    %cst = arith.constant 0.000000e+00 : f32
    %1 = vector.broadcast %cst : f32 to vector<4x512xf32>
    %2 = arith.maximumf %0, %1 : vector<4x512xf32>
    %c0_1 = arith.constant 0 : index
    %c0_2 = arith.constant 0 : index
    %3 = vector.load %arg2[%c0_1, %c0_2] : memref<4x512xf32, #tpu.memory_space<vmem>>, vector<4x512xf32>
    tpu.vector_store %arg2[%c0_1, %c0_2], %2 {strides = array<i32>} : memref<4x512xf32, #tpu.memory_space<vmem>>, vector<4x512xf32>,
    return
  }
  func.func @transform_0(%arg0: i32) -> (i32, i32) {
    %c0_i32 = arith.constant 0 : i32
    %c0_i32_0 = arith.constant 0 : i32
    return %arg0, %c0_i32 : i32, i32
  }
  func.func @transform_1(%arg0: i32) -> (i32, i32) {
    %c0_i32 = arith.constant 0 : i32
    %c0_i32_0 = arith.constant 0 : i32
    return %arg0, %c0_i32 : i32, i32
  }
}

</mosaic_0001>

<bundles_post_ra>
// kernel: relu_layer.1
= control target key start
LH: loop header
LB: loop body
LE: loop exit
PB: predicated region body
PF: predicated region fallthrough
CT: control target
= control target key end

     0   :  { %s40_s0 = inlined_call_operand.vmem [shape: f32[4,512], index: 0, kind: input, shape index: {}]   ;;  %s41_s1 = inlined_call_operand.vmem [shape: f32[4,512], index: 1, kind: output, shape index: {}]  }
   0x1   :  { %v8_v0 = vld [vmem:[%s40_s0] sm:$0xff]  ;;  %v9_v1 = vld [vmem:[%s40_s0 + $0x8] sm:$0xff] }
   0x2   :  { %v10_v2 = vmax.f32 %v8_v0, 0.0  ;;  %v11_v3 = vmax.f32 %v9_v1, 0.0 }
   0x4   :  { %12 = vst [vmem:[%s41_s1] sm:$0xff] %v10_v2  ;;  %13 = vst [vmem:[%s41_s1 + $0x8] sm:$0xff] %v11_v3 }

</bundles_post_ra>
